<compile_context>
chip_gen: v7x
topology: tpu7x:2x2x1
jax: 0.10.0
libtpu: 0.0.40
codegen_flags: <defaults>
</compile_context>

<pallas_src>
import functools

import jax
import jax.numpy as jnp
import numpy as np
from jax.experimental import pallas as pl
from jax.experimental.pallas import tpu as pltpu


# ----------------------------------------------------------------------------
# Device-dependent knobs
# ----------------------------------------------------------------------------
def _device_kind() -> str:
    try:
        return jax.devices()[0].device_kind.lower()
    except Exception:
        return ""


def _elementwise_dtype():
    """Dtype for the tap roll/mask math.

    v6e/v7x have a native bf16 VPU -> do the 16 rolls + masked selects in bf16
    (halves XLU/VPU data moved).  v5e and older have no bf16 VPU, so keep the
    elementwise tap math in f32 there and cast only at the MXU operand.
    """
    kind = _device_kind()
    if "v6" in kind or "v7" in kind:
        return jnp.bfloat16
    return jnp.float32


def _vmem_limit_bytes() -> int:
    kind = _device_kind()
    if "v5" in kind or "v6" in kind:
        return 96 * 1024 * 1024     # 128 MiB physical VMEM -> raise scoped limit
    if "v7" in kind:
        return 48 * 1024 * 1024     # 64 MiB physical VMEM -> leave headroom
    return 32 * 1024 * 1024         # conservative default elsewhere


# ----------------------------------------------------------------------------
# pltpu.roll convention guard
# ----------------------------------------------------------------------------
@functools.lru_cache(maxsize=None)
def _roll_follows_numpy() -> bool:
    """One-time probe: does pltpu.roll follow jnp.roll's shift convention?

    The 3x3 taps silently become a 180-degree rotated stencil if the rotate
    direction ever differs from jnp.roll, so probe once on the real backend
    (trivial (8,128) kernel, cached) and adapt the shift sign accordingly.
    """
    def kern(x_ref, o_ref):
        o_ref[...] = pltpu.roll(x_ref[...], shift=1, axis=1)

    x = jnp.tile(jnp.arange(128, dtype=jnp.float32)[None, :], (8, 1))
    out = pl.pallas_call(
        kern, out_shape=jax.ShapeDtypeStruct((8, 128), jnp.float32))(x)
    # jnp.roll(arange, 1)[0] == 127
    return float(np.asarray(out)[0, 0]) == 127.0


# ----------------------------------------------------------------------------
# Pallas kernel: per-image lane-dense (C, H*W) tiles, batch on the block axis.
# ----------------------------------------------------------------------------
def _up_block_kernel(xu_ref, pv_ref, wau_ref, wap_ref, w12_ref, w21b_ref,
                     w22_ref, o_ref, win_ref, *, H, W, roll_numpy, tap_dtype):
    # xu_ref  : (NB, in_c,   HW) bf16  upsampled x, NCHW view (lane-dense HW)
    # pv_ref  : (NB, skip_c, HW) bf16  skip connection
    # wau_ref : (2*Cout, in_c)   bf16  stacked [w11 ; w21a] columns acting on x_up
    # wap_ref : (2*Cout, skip_c) bf16  stacked [w11 ; w21a] columns acting on prev
    # w12_ref : (Cout, 9*Cout)   bf16  3x3 conv12, im2col-packed (dy, dx, ci)
    # w21b_ref: (Cout, Cout)     bf16  1x1 conv21 slice acting on conv12 output
    # w22_ref : (Cout, 9*Cout)   bf16  3x3 conv22, im2col-packed
    # o_ref   : (NB, Cout, HW)   bf16  lane-dense output
    # win_ref : (9*Cout, HW)     bf16  shared VMEM im2col window scratch
    NB = xu_ref.shape[0]
    HW = xu_ref.shape[2]
    Cout = o_ref.shape[1]

    # Per-pixel (x, y) coords along the lane axis, generated in-kernel (no HBM
    # coordinate stream).  Every block holds whole images, so coords are local.
    lane = jax.lax.broadcasted_iota(jnp.int32, (1, HW), 1)
    xi = lane % W
    yi = lane // W
    x_ok = (xi >= 1, None, xi <= W - 2)          # dx = 0, 1, 2
    y_ok = (yi >= 1, None, yi <= H - 2)          # dy = 0, 1, 2
    tap_masks = []
    for dy in range(3):
        for dx in range(3):
            m = y_ok[dy]
            if x_ok[dx] is not None:
                m = x_ok[dx] if m is None else jnp.logical_and(m, x_ok[dx])
            tap_masks.append(m)                  # None for the centre tap

    # Hoist weight loads out of the per-image loop.
    wau = wau_ref[...]
    wap = wap_ref[...]
    w12 = w12_ref[...]
    w21b = w21b_ref[...]
    w22 = w22_ref[...]

    def conv3x3(h_f32, w):
        """3x3 conv, padding=1: 9 lane-rolled + masked taps written into the
        shared im2col scratch, then a single K=9*Cout matmul (f32 accum)."""
        h = h_f32.astype(tap_dtype)
        for k in range(9):
            dy, dx = divmod(k, 3)
            s = (dy - 1) * W + (dx - 1)          # flat offset of the source pixel
            if s == 0:
                t = h
            else:
                amt = (-s if roll_numpy else s) % HW
                t = pltpu.roll(h, shift=amt, axis=1)     # XLU lane rotate
            m = tap_masks[k]
            if m is not None:
                t = jnp.where(m, t, 0)           # kill wrap-around / padding taps
            win_ref[pl.ds(k * Cout, Cout), :] = t.astype(win_ref.dtype)
        return jnp.dot(w, win_ref[...], preferred_element_type=jnp.float32)

    for b in range(NB):                          # NB is small & static (unrolled)
        xu = xu_ref[b]                           # (in_c, HW)   bf16
        pv = pv_ref[b]                           # (skip_c, HW) bf16
        # Fused 1x1 convs sharing x: rows [:Cout] = conv11, rows [Cout:] = conv21|x
        a = (jnp.dot(wau, xu, preferred_element_type=jnp.float32)
             + jnp.dot(wap, pv, preferred_element_type=jnp.float32))
        h1 = jnp.maximum(a[:Cout], 0.0)                          # conv11 + ReLU
        h2 = jnp.maximum(conv3x3(h1, w12), 0.0)                  # conv12 + ReLU
        h3 = jnp.maximum(                                        # conv21 + ReLU
            a[Cout:] + jnp.dot(w21b, h2.astype(jnp.bfloat16),
                               preferred_element_type=jnp.float32), 0.0)
        h4 = jnp.maximum(conv3x3(h3, w22), 0.0)                  # conv22 + ReLU
        o_ref[b] = h4.astype(o_ref.dtype)


# ----------------------------------------------------------------------------
# Wrapper: whole-image block-size choice + pallas_call
# ----------------------------------------------------------------------------
def _pick_images_per_step(N, HW, cin_total, cout):
    """Whole images per grid step.

    Target ~4096 lanes per step as a *floor* (amortizes per-step overhead),
    cap the per-step VMEM working set, and keep >=2 parallel grid steps when
    the batch permits (v7x has 2 TensorCores to feed).
    """
    target_lanes = 4096
    nb = max(1, -(-target_lanes // HW))          # ceil: lane floor, not a cap
    per_img = HW * (4 * (cin_total + cout)       # streamed bf16 blocks, dbl-buffered
                    + 6 * cout * 4               # f32 intermediates
                    + 9 * cout * 2)              # im2col window (bf16)
    budget = 12 * 1024 * 1024
    nb = min(nb, max(1, budget // max(per_img, 1)))
    nb = min(nb, N)
    if N >= 2:
        nb = min(nb, N // 2)                     # >=2 parallel steps (v7x megacore)
    nb = max(nb, 1)
    while N % nb != 0:
        nb -= 1
    return nb


def up_block_pallas(xu, pv, wa_up, wa_prev, w12p, w21b, w22p, *, H, W):
    """xu: (N, in_c, H*W) bf16, pv: (N, skip_c, H*W) bf16 -> (N, Cout, H*W) bf16."""
    N, in_c, HW = xu.shape
    skip_c = pv.shape[1]
    Cout = w12p.shape[0]
    assert HW == H * W
    assert wa_up.shape == (2 * Cout, in_c) and wa_prev.shape == (2 * Cout, skip_c)

    NB = _pick_images_per_step(N, HW, in_c + skip_c, Cout)
    grid = (N // NB,)

    kernel = functools.partial(
        _up_block_kernel, H=H, W=W,
        roll_numpy=_roll_follows_numpy(), tap_dtype=_elementwise_dtype())

    grid_spec = pltpu.PrefetchScalarGridSpec(
        num_scalar_prefetch=0,
        grid=grid,
        in_specs=[
            pl.BlockSpec((NB, in_c, HW), lambda i: (i, 0, 0)),     # upsampled x
            pl.BlockSpec((NB, skip_c, HW), lambda i: (i, 0, 0)),   # skip (prev)
            pl.BlockSpec((2 * Cout, in_c), lambda i: (0, 0)),      # [w11;w21a] | up
            pl.BlockSpec((2 * Cout, skip_c), lambda i: (0, 0)),    # [w11;w21a] | prev
            pl.BlockSpec((Cout, 9 * Cout), lambda i: (0, 0)),      # w12 (im2col)
            pl.BlockSpec((Cout, Cout), lambda i: (0, 0)),          # w21b
            pl.BlockSpec((Cout, 9 * Cout), lambda i: (0, 0)),      # w22 (im2col)
        ],
        out_specs=pl.BlockSpec((NB, Cout, HW), lambda i: (i, 0, 0)),
        scratch_shapes=[pltpu.VMEM((9 * Cout, HW), jnp.bfloat16)],  # im2col window
    )
    return pl.pallas_call(
        kernel,
        out_shape=jax.ShapeDtypeStruct((N, Cout, HW), jnp.bfloat16),
        grid_spec=grid_spec,
        compiler_params=pltpu.CompilerParams(
            dimension_semantics=("parallel",),
            vmem_limit_bytes=_vmem_limit_bytes()),
    )(xu, pv, wa_up, wa_prev, w12p, w21b, w22p)


# ----------------------------------------------------------------------------
# Module-level forward (glue + kernel), mirroring DenseNet2D_up_block.forward
# ----------------------------------------------------------------------------
def dense_up_block_forward(prev_nchw, x_nchw, params, up_stride):
    N, C, H0, W0 = x_nchw.shape
    H, W = H0 * up_stride, W0 * up_stride
    # F.interpolate(mode='bilinear', align_corners=False): jax.image.resize
    # 'bilinear' uses the same half-pixel-center convention.
    x_up = jax.image.resize(x_nchw, (N, C, H, W), method="bilinear")
    # Natural NCHW view: reshape to (N, C, H*W) is free (no HBM transpose), and
    # x_up / prev stay separate inputs (channel concat is folded into weights).
    xu = x_up.reshape(N, C, H * W).astype(jnp.bfloat16)
    pv = prev_nchw.reshape(N, prev_nchw.shape[1], H * W).astype(jnp.bfloat16)

    out = up_block_pallas(xu, pv, params["wa_up"], params["wa_prev"],
                          params["w12p"], params["w21b"], params["w22p"],
                          H=H, W=W)
    Cout = out.shape[1]
    return out.reshape(N, Cout, H, W)            # bf16 NCHW (free reshape)


# ----------------------------------------------------------------------------
# Pure-JAX reference (lax.conv), PyTorch semantics, NCHW / OIHW
# ----------------------------------------------------------------------------
def _conv_nchw(x, w_oihw, pad):
    return jax.lax.conv_general_dilated(
        x, w_oihw, window_strides=(1, 1), padding=pad,
        dimension_numbers=("NCHW", "OIHW", "NCHW"))


def reference_forward(prev_nchw, x_nchw, w11, w12, w21, w22, up_stride,
                      cast_input_dtype=None):
    N, C, H, W = x_nchw.shape
    x_up = jax.image.resize(
        x_nchw, (N, C, H * up_stride, W * up_stride), method="bilinear")
    x = jnp.concatenate([x_up, prev_nchw], axis=1)
    if cast_input_dtype is not None:
        # Feed the reference the same rounded activations the kernel consumes.
        x = x.astype(cast_input_dtype).astype(jnp.float32)
    out = jax.nn.relu(_conv_nchw(x, w11, "VALID"))
    out = jax.nn.relu(_conv_nchw(out, w12, [(1, 1), (1, 1)]))
    out = jnp.concatenate([x, out], axis=1)
    out = jax.nn.relu(_conv_nchw(out, w21, "VALID"))
    out = jax.nn.relu(_conv_nchw(out, w22, [(1, 1), (1, 1)]))
    return out


if __name__ == "__main__":
    # Small shapes consistent with the module:
    #   skip_c=4, in_c=4, out_c=8, up_stride=2, batch=2, spatial 16 (skip) / 8 (x)
    skip_c, in_c, out_c, up_stride = 4, 4, 8, 2
    N, Hs, Ws = 2, 16, 16
    Cin = skip_c + in_c

    key = jax.random.PRNGKey(0)
    k_prev, k_x, k11, k12, k21, k22 = jax.random.split(key, 6)

    prev = jax.random.normal(k_prev, (N, skip_c, Hs, Ws), jnp.float32)
    x = jax.random.normal(k_x, (N, in_c, Hs // up_stride, Ws // up_stride),
                          jnp.float32)

    def winit(k, shape):                     # PyTorch OIHW convention, bias=False
        fan_in = shape[1] * shape[2] * shape[3]
        return jax.random.normal(k, shape, jnp.float32) / np.sqrt(fan_in)

    w11 = winit(k11, (out_c, Cin, 1, 1))
    w12 = winit(k12, (out_c, out_c, 3, 3))
    w21 = winit(k21, (out_c, Cin + out_c, 1, 1))
    w22 = winit(k22, (out_c, out_c, 3, 3))

    # The kernel consumes bf16 operands; hand the f32 reference the identical
    # bf16-rounded weights/activations so the comparison isolates kernel math.
    rnd = lambda w: w.astype(jnp.bfloat16).astype(jnp.float32)
    w11r, w12r, w21r, w22r = rnd(w11), rnd(w12), rnd(w21), rnd(w22)

    def pack3x3(w):   # OIHW -> (O, 9*I), tap-major (dy, dx), input-channel minor
        O, I = w.shape[0], w.shape[1]
        return jnp.transpose(w, (0, 2, 3, 1)).reshape(O, 9 * I).astype(jnp.bfloat16)

    # Fuse the two 1x1 weights that act on x: rows [:out_c] = conv11,
    # rows [out_c:] = conv21's x-slice; columns split by cat([x_up, prev]) order.
    w11_2d = w11r[:, :, 0, 0]                    # (out_c, Cin)
    w21_2d = w21r[:, :, 0, 0]                    # (out_c, Cin + out_c)
    wa = jnp.concatenate([w11_2d, w21_2d[:, :Cin]], axis=0)   # (2*out_c, Cin)
    params = {
        "wa_up": wa[:, :in_c].astype(jnp.bfloat16),        # (2*out_c, in_c)
        "wa_prev": wa[:, in_c:].astype(jnp.bfloat16),      # (2*out_c, skip_c)
        "w12p": pack3x3(w12r),                             # (out_c, 9*out_c)
        "w21b": w21_2d[:, Cin:].astype(jnp.bfloat16),      # (out_c, out_c)
        "w22p": pack3x3(w22r),                             # (out_c, 9*out_c)
    }

    _roll_follows_numpy()   # warm the cached roll-convention probe outside jit

    fwd = jax.jit(functools.partial(dense_up_block_forward, up_stride=up_stride))
    out = jax.block_until_ready(fwd(prev, x, params))

    ref = jax.block_until_ready(
        reference_forward(prev, x, w11r, w12r, w21r, w22r, up_stride,
                          cast_input_dtype=jnp.bfloat16))

    assert out.shape == (N, out_c, Hs, Ws), out.shape
    assert out.dtype == jnp.bfloat16, out.dtype
    # Kernel rounds intermediates (h1/h2/h3) and the final output to bf16 while
    # the reference keeps f32 -> allow ~3e-2 level differences.
    np.testing.assert_allclose(np.asarray(out.astype(jnp.float32)),
                               np.asarray(ref), rtol=3e-2, atol=3e-2)
    print("KERNEL_OK")
</pallas_src>

<mosaic_0001>
module attributes {stable_mosaic.version = 11 : i64} {
  func.func @kern(%arg0: memref<8x128xf32, #tpu.memory_space<vmem>>, %arg1: memref<8x128xf32, #tpu.memory_space<vmem>>) attributes {dimension_semantics = [], scalar_prefetch = 0 : i64, scratch_operands = 0 : i64, tpu.core_type = #tpu.core_type<tc>} {
    %c0 = arith.constant 0 : index
    %c0_0 = arith.constant 0 : index
    %0 = vector.load %arg0[%c0, %c0_0] : memref<8x128xf32, #tpu.memory_space<vmem>>, vector<8x128xf32>
    %c1_i32 = arith.constant 1 : i32
    %1 = tpu.dynamic_rotate %0 by %c1_i32 dim 1 : vector<8x128xf32>, i32 -> vector<8x128xf32>
    %c0_1 = arith.constant 0 : index
    %c0_2 = arith.constant 0 : index
    %2 = vector.load %arg1[%c0_1, %c0_2] : memref<8x128xf32, #tpu.memory_space<vmem>>, vector<8x128xf32>
    tpu.vector_store %arg1[%c0_1, %c0_2], %1 {strides = array<i32>} : memref<8x128xf32, #tpu.memory_space<vmem>>, vector<8x128xf32>,
    return
  }
}

</mosaic_0001>

<bundles_post_ra>
// kernel: tpu_custom_call.1
= control target key start
LH: loop header
LB: loop body
LE: loop exit
PB: predicated region body
PF: predicated region fallthrough
CT: control target
= control target key end

     0   :  { %6 = vsyncpa [#allocation3], 0  ;;  %s128_s0 = inlined_call_operand.hbm [shape: f32[8,128], index: 0, kind: input, shape index: {}]   ;;  %s129_s1 = inlined_call_operand.hbm [shape: f32[8,128], index: 1, kind: output, shape index: {}]  }
   0x1   :  { %7 = vsyncpa [#allocation4], 0  ;;  %s91_s6 = smov [#allocation2]   ;;  %s43_s10 = scalar_lea.hbm %s128_s0, 128 }
   0x2   :  { %s14_s7 = sshll.u32 %s91_s6, 4  ;;  %p44_p0 = scmp.ne.s32.totalorder %s128_s0, %s43_s10  ;;  %s15_s7 = int_to_ptr.vmem [resolvable:$true] %s14_s7 }
   0x3   :  { %p47_p1 = scmp.lt.u32.totalorder %s43_s10, %s128_s0 }
   0x5   :  { %p49_p2 = pnand %p47_p1, %p44_p0 }
   0x7   :  { %52 = shalt.err (!%p49_p2)
}
   0x8   :  { %s53_s15 = scalar_lea.vmem %s15_s7, 128  ;;  %p58_p4 = scmp.lt.s32.totalorder %s15_s7, %s15_s7 }
   0x9   :  { %p54_p3 = scmp.ne.s32.totalorder %s15_s7, %s53_s15  ;;  %p59_p5 = scmp.lt.s32.totalorder %s53_s15, %s53_s15 }
   0xb   :  { %p60_p6 = por %p59_p5, %p58_p4 }
   0xd   :  { %p61_p7 = pnand %p60_p6, %p54_p3 }
   0xf   :  { %64 = shalt.err (!%p61_p7)
}
  0x10   :  { %17 = dma.hbm_to_vmem [thread:$0]  %s128_s0, 128, %s15_s7, [#allocation3]  }
  0x11   :  { %87 = dma.done.wait [#allocation3], 128  }
  0x12   :  { %88 = vsyncadd [#allocation3], 4294967168  ;;  %v21_v0 = vld [vmem:[#allocation2] sm:$0xff]  ;;  %s92_s18 = smov 1   ;;  %s93_s19 = smov [#allocation5]  }
  0x13   :  { %22 = vrot.lane.b32.xlu0 %v21_v0, %s92_s18  ;;  %s31_s20 = sshll.u32 %s93_s19, 4  ;;  %s32_s20 = int_to_ptr.vmem [resolvable:$true] %s31_s20 }
  0x14   :  { %s65_s21 = scalar_lea.vmem %s32_s20, 128  ;;  %p70_p9 = scmp.lt.s32.totalorder %s32_s20, %s32_s20 }
  0x15   :  { %p66_p8 = scmp.ne.s32.totalorder %s32_s20, %s65_s21  ;;  %p71_p10 = scmp.lt.s32.totalorder %s65_s21, %s65_s21 }
  0x17   :  { %p72_p11 = por %p71_p10, %p70_p9 }
  0x19   :  { %p73_p12 = pnand %p72_p11, %p66_p8 }
  0x85   :  { %v23_v1 = vpop.permute.xlu0 %22 }
  0x86   :  { %24 = vst [vmem:[#allocation5] sm:$0xff] %v23_v1 }
  0x87   :  { %76 = shalt.err (!%p73_p12)
}
  0x88   :  { %s77_s0 = scalar_lea.hbm %s129_s1, 128 }
  0x89   :  { %p78_p13 = scmp.ne.s32.totalorder %s129_s1, %s77_s0  ;;  %p81_p0 = scmp.lt.u32.totalorder %s77_s0, %s129_s1 }
  0x8b   :  { %p83_p1 = pnand %p81_p0, %p78_p13 }
  0x8d   :  { %86 = shalt.err (!%p83_p1)
}
  0x8e   :  { %34 = dma.vmem_to_hbm [thread:$0]  %s32_s20, 128, %s129_s1, [#allocation4]  }
  0x8f   :  { %89 = dma.done.wait [#allocation4], 128  }
  0x90   :  { %90 = vsyncadd [#allocation4], 4294967168 }
  0x91   :  { %38 = vsyncpa [#allocation3], 1 }
  0x92   :  { %39 = vsyncpa [#allocation4], 1 }

</bundles_post_ra>
